<compile_context>
chip_gen: v5e
topology: v5e:2x2
jax: 0.10.0
libtpu: 0.0.40
codegen_flags: <defaults>
</compile_context>

<pallas_src>
import jax
import jax.numpy as jnp
import numpy as np
from jax import lax
from jax.experimental import pallas as pl
from jax.experimental.pallas import tpu as pltpu

# dot_general dimension numbers for A @ B^T (contract the last dim of both operands).
_TRANS_B_DIMS = (((1,), (1,)), ((), ()))


def _mlp_kernel(x_ref,
                w1_ref, b1_ref,
                w2_ref, b2_ref,
                w3_ref, b3_ref,
                w4_ref, b4_ref,
                o_ref):
    """Fused 4-layer MLP forward for one batch tile (all weights resident in VMEM)."""
    # In-kernel bf16 cast: x arrives in native f32, so its HBM stream is read exactly once.
    x = x_ref[...].astype(jnp.bfloat16)                               # (bm, Din)

    # fc1 -> relu        (BN1 affine folded into fc2; dropout1 == identity)
    h = jnp.dot(x, w1_ref[...], preferred_element_type=jnp.float32) + b1_ref[...]
    h = jnp.maximum(h, 0.0)

    # fc2 -> relu        (BN2 affine folded into fc3; dropout2 == identity)
    h = jnp.dot(h.astype(jnp.bfloat16), w2_ref[...],
                preferred_element_type=jnp.float32) + b2_ref[...]
    h = jnp.maximum(h, 0.0)

    # fc3 -> relu        (BN3 affine folded into fc4; dropout3 == identity)
    h = jnp.dot(h.astype(jnp.bfloat16), w3_ref[...],
                preferred_element_type=jnp.float32) + b3_ref[...]
    h = jnp.maximum(h, 0.0)                                           # (bm, 32) f32

    # fc4, emitted lane-dense: out = w4_rows @ h^T -> (8, bm); row 0 holds the result
    # (w4 is zero-padded to 8 sublanes on the host).
    out_rows = lax.dot_general(w4_ref[...], h.astype(jnp.bfloat16),
                               dimension_numbers=_TRANS_B_DIMS,
                               preferred_element_type=jnp.float32)
    o_ref[...] = out_rows[0:1, :] + b4_ref[...]                       # (1, bm) full-width store


def _fold_batchnorm(params):
    """Fold the inference-mode BatchNorm affines (scale/shift) into the next Linear.

    Module order is Linear -> ReLU -> BatchNorm -> Dropout, so at inference
      bn(relu(x @ Wk + bk)) @ Wk1 + bk1
        == relu(x @ Wk + bk) @ (diag(scale) @ Wk1) + (shift @ Wk1 + bk1),
    i.e. the BN affine folds forward into the next Linear.
    """
    (w1, b1, s1, t1, w2, b2, s2, t2, w3, b3, s3, t3, w4, b4) = params
    w2f = s1.reshape(-1, 1) * w2          # diag(s1) @ W2
    b2f = t1 @ w2 + b2
    w3f = s2.reshape(-1, 1) * w3
    b3f = t2 @ w3 + b3
    w4f = s3.reshape(-1, 1) * w4          # (32, 1)
    b4f = t3 @ w4 + b4                    # (1, 1)
    # fc4 weight as a sublane-padded (8, 32) row block: row 0 = real weights, rest zero.
    w4row = jnp.zeros((8, w4f.shape[0]), jnp.float32).at[0].set(w4f[:, 0])
    return w1, b1, w2f, b2f, w3f, b3f, w4row, b4f


def prepare_params(params):
    """One-time parameter prep: BN folding + bf16 weight casts (hoisted out of the call path).

    Biases stay f32 (added post-accumulation in the kernel).
    """
    w1, b1, w2f, b2f, w3f, b3f, w4row, b4f = _fold_batchnorm(params)
    return (w1.astype(jnp.bfloat16), b1,
            w2f.astype(jnp.bfloat16), b2f,
            w3f.astype(jnp.bfloat16), b3f,
            w4row.astype(jnp.bfloat16), b4f)


def _round_up(v, m):
    return ((v + m - 1) // m) * m


def _pick_bm(B, Din):
    """Batch-tile (rows per grid step) selection."""
    if B <= 128:
        return B                     # single tile: zero per-step overhead, not enough work to split
    # >= 2 tiles of 128-row multiples so the "parallel" axis shards across both v7x
    # TensorCores; cap at 1024 rows, and keep the double-buffered f32 x tile under ~8 MiB
    # so it comfortably fits the v7x 32 MiB scoped-VMEM default (conservative on v5e/v6e).
    bm = min(1024, _round_up(pl.cdiv(B, 2), 128))
    vmem_cap_rows = max(128, ((8 << 20) // (2 * Din * 4)) // 128 * 128)
    return min(bm, vmem_cap_rows)


def inhalation_classifier_forward(x, prepared_params, *, bm=None):
    """Fused MLP forward (inference semantics). `prepared_params` comes from prepare_params()."""
    B, Din = x.shape
    w1b, b1, w2b, b2f, w3b, b3f, w4b, b4f = prepared_params

    if bm is None:
        bm = _pick_bm(B, Din)
    if B > bm:
        assert bm % 128 == 0, "batch tile must be a multiple of 128 when tiling"
    grid = pl.cdiv(B, bm)
    B_pad = grid * bm
    if B_pad != B:
        x = jnp.pad(x, ((0, B_pad - B), (0, 0)))

    def replicated(arr):
        # Non-tiled operand: same (only) block for every grid step; Pallas skips
        # re-copying when the block index does not change.
        return pl.BlockSpec(arr.shape, lambda i: (0, 0))

    in_specs = [
        pl.BlockSpec((bm, Din), lambda i: (i, 0)),      # x: tiled over batch, native dtype
        replicated(w1b), replicated(b1),
        replicated(w2b), replicated(b2f),
        replicated(w3b), replicated(b3f),
        replicated(w4b), replicated(b4f),
    ]
    # Lane-dense output: one (1, bm) row per grid step; reshaped to (B, 1) below.
    out_specs = pl.BlockSpec((1, bm), lambda i: (0, i))

    flops = 2 * B_pad * (Din * 128 + 128 * 64 + 64 * 32 + 32 * 1)
    bytes_accessed = (
        B_pad * Din * x.dtype.itemsize + B_pad * 4
        + sum(int(np.prod(w.shape)) * 2 for w in (w1b, w2b, w3b, w4b))
        + sum(int(np.prod(b.shape)) * 4 for b in (b1, b2f, b3f, b4f))
    )

    out_row = pl.pallas_call(
        _mlp_kernel,
        out_shape=jax.ShapeDtypeStruct((1, B_pad), jnp.float32),
        grid_spec=pltpu.PrefetchScalarGridSpec(
            num_scalar_prefetch=0,
            grid=(grid,),
            in_specs=in_specs,
            out_specs=out_specs,
        ),
        compiler_params=pltpu.CompilerParams(
            dimension_semantics=("parallel",)),
        cost_estimate=pl.CostEstimate(flops=flops, transcendentals=0,
                                      bytes_accessed=bytes_accessed),
    )(x, w1b, b1, w2b, b2f, w3b, b3f, w4b, b4f)

    return out_row.reshape(B_pad, 1)[:B]


# Jitted entry point: pad + kernel + reshape are one XLA program; tile selection is
# trace-time Python on static shapes; weight prep was hoisted into prepare_params().
inhalation_classifier_forward_jit = jax.jit(
    inhalation_classifier_forward, static_argnames=("bm",))


def init_params(key, input_size):
    """Parameter init mirroring nn.Linear / nn.BatchNorm1d shapes.

    Weights are stored transposed vs. PyTorch, i.e. (in_features, out_features).
    BatchNorm parameters / running stats are drawn non-trivially so that the
    scale/shift folding is actually exercised (inference semantics are identical).
    """
    sizes = [(input_size, 128), (128, 64), (64, 32), (32, 1)]
    params = []
    keys = jax.random.split(key, 6 * len(sizes))
    eps = 1e-5
    for li, (fan_in, fan_out) in enumerate(sizes):
        kw, kb, kg, kbe, km, kv = keys[6 * li:6 * li + 6]
        bound = 1.0 / np.sqrt(fan_in)
        w = jax.random.uniform(kw, (fan_in, fan_out),
                               minval=-bound, maxval=bound, dtype=jnp.float32)
        b = jax.random.uniform(kb, (1, fan_out),
                               minval=-bound, maxval=bound, dtype=jnp.float32)
        params += [w, b]
        if fan_out != 1:  # BatchNorm1d follows fc1/fc2/fc3 only
            gamma = jax.random.uniform(kg, (1, fan_out), minval=0.5, maxval=1.5,
                                       dtype=jnp.float32)
            beta = 0.1 * jax.random.normal(kbe, (1, fan_out), dtype=jnp.float32)
            running_mean = 0.1 * jax.random.normal(km, (1, fan_out), dtype=jnp.float32)
            running_var = jax.random.uniform(kv, (1, fan_out), minval=0.5, maxval=1.5,
                                             dtype=jnp.float32)
            scale = gamma / jnp.sqrt(running_var + eps)
            shift = beta - running_mean * scale
            params += [scale, shift]
    return tuple(params)


def reference_forward_f32(x, params):
    """Pure-JAX f32 reference with BatchNorm applied explicitly (un-folded), eval-mode."""
    (w1, b1, s1, t1, w2, b2, s2, t2, w3, b3, s3, t3, w4, b4) = params
    h = jnp.maximum(x @ w1 + b1, 0.0) * s1 + t1
    h = jnp.maximum(h @ w2 + b2, 0.0) * s2 + t2
    h = jnp.maximum(h @ w3 + b3, 0.0) * s3 + t3
    return h @ w4 + b4


if __name__ == "__main__":
    key = jax.random.PRNGKey(0)
    kx, kp, kx2 = jax.random.split(key, 3)

    INPUT_SIZE = 32
    params = init_params(kp, INPUT_SIZE)
    prepared = prepare_params(params)          # one-time weight prep (BN fold + bf16 cast)

    # Small batch: single-tile (grid = 1) path.
    B = 16
    x = jax.random.normal(kx, (B, INPUT_SIZE), dtype=jnp.float32)
    out = jax.block_until_ready(inhalation_classifier_forward_jit(x, prepared))
    assert out.shape == (B, 1)
    ref = reference_forward_f32(x, params)
    # Loose tolerance: kernel uses bf16 matmul inputs (f32 accumulation) vs. f32 reference.
    np.testing.assert_allclose(np.asarray(out), np.asarray(ref), rtol=5e-2, atol=5e-2)

    # Larger ragged batch: tiled (grid = 2, two TC-shardable steps) path with padding.
    B2 = 384
    x2 = jax.random.normal(kx2, (B2, INPUT_SIZE), dtype=jnp.float32)
    out2 = jax.block_until_ready(inhalation_classifier_forward_jit(x2, prepared))
    assert out2.shape == (B2, 1)
    ref2 = reference_forward_f32(x2, params)
    np.testing.assert_allclose(np.asarray(out2), np.asarray(ref2), rtol=5e-2, atol=5e-2)

    print("KERNEL_OK")
</pallas_src>

<mosaic_0001>
module attributes {stable_mosaic.version = 11 : i64} {
  func.func @_mlp_kernel(%arg0: i32, %arg1: memref<16x32xf32, #tpu.memory_space<vmem>>, %arg2: memref<32x128xbf16, #tpu.memory_space<vmem>>, %arg3: memref<1x128xf32, #tpu.memory_space<vmem>>, %arg4: memref<128x64xbf16, #tpu.memory_space<vmem>>, %arg5: memref<1x64xf32, #tpu.memory_space<vmem>>, %arg6: memref<64x32xbf16, #tpu.memory_space<vmem>>, %arg7: memref<1x32xf32, #tpu.memory_space<vmem>>, %arg8: memref<8x32xbf16, #tpu.memory_space<vmem>>, %arg9: memref<1x1xf32, #tpu.memory_space<vmem>>, %arg10: memref<1x16xf32, #tpu.memory_space<vmem>>) attributes {dimension_semantics = [#tpu.dimension_semantics<parallel>], iteration_bounds = array<i64: 1>, scalar_prefetch = 0 : i64, scratch_operands = 0 : i64, tpu.core_type = #tpu.core_type<tc>, window_params = [{transform_indices = @transform_0, window_bounds = array<i64: 16, 32>}, {pipeline_mode = #tpu.pipeline_mode<synchronous>, transform_indices = @transform_1, window_bounds = array<i64: 32, 128>}, {pipeline_mode = #tpu.pipeline_mode<synchronous>, transform_indices = @transform_2, window_bounds = array<i64: 1, 128>}, {pipeline_mode = #tpu.pipeline_mode<synchronous>, transform_indices = @transform_3, window_bounds = array<i64: 128, 64>}, {pipeline_mode = #tpu.pipeline_mode<synchronous>, transform_indices = @transform_4, window_bounds = array<i64: 1, 64>}, {pipeline_mode = #tpu.pipeline_mode<synchronous>, transform_indices = @transform_5, window_bounds = array<i64: 64, 32>}, {pipeline_mode = #tpu.pipeline_mode<synchronous>, transform_indices = @transform_6, window_bounds = array<i64: 1, 32>}, {pipeline_mode = #tpu.pipeline_mode<synchronous>, transform_indices = @transform_7, window_bounds = array<i64: 8, 32>}, {pipeline_mode = #tpu.pipeline_mode<synchronous>, transform_indices = @transform_8, window_bounds = array<i64: 1, 1>}, {transform_indices = @transform_9, window_bounds = array<i64: 1, 16>}]} {
    %c0 = arith.constant 0 : index
    %c0_0 = arith.constant 0 : index
    %0 = vector.load %arg1[%c0, %c0_0] : memref<16x32xf32, #tpu.memory_space<vmem>>, vector<16x32xf32>
    %1 = arith.truncf %0 : vector<16x32xf32> to vector<16x32xbf16>
    %c0_1 = arith.constant 0 : index
    %c0_2 = arith.constant 0 : index
    %2 = vector.load %arg2[%c0_1, %c0_2] : memref<32x128xbf16, #tpu.memory_space<vmem>>, vector<32x128xbf16>
    %cst = arith.constant dense<0.000000e+00> : vector<16x128xf32>
    %3 = tpu.matmul %1, %2, %cst {dimension_numbers = #tpu.dot_dimension_numbers<[1], [0], [0], [1], [0, 0, 1, 1], [], []>} : vector<16x32xbf16>, vector<32x128xbf16>, vector<16x128xf32> -> vector<16x128xf32>
    %c0_3 = arith.constant 0 : index
    %c0_4 = arith.constant 0 : index
    %4 = vector.load %arg3[%c0_3, %c0_4] : memref<1x128xf32, #tpu.memory_space<vmem>>, vector<1x128xf32>
    %5 = vector.broadcast %4 : vector<1x128xf32> to vector<16x128xf32>
    %6 = arith.addf %3, %5 : vector<16x128xf32>
    %cst_5 = arith.constant 0.000000e+00 : f32
    %7 = vector.broadcast %cst_5 : f32 to vector<16x128xf32>
    %8 = arith.maximumf %6, %7 : vector<16x128xf32>
    %9 = arith.truncf %8 : vector<16x128xf32> to vector<16x128xbf16>
    %c0_6 = arith.constant 0 : index
    %c0_7 = arith.constant 0 : index
    %10 = vector.load %arg4[%c0_6, %c0_7] : memref<128x64xbf16, #tpu.memory_space<vmem>>, vector<128x64xbf16>
    %cst_8 = arith.constant dense<0.000000e+00> : vector<16x64xf32>
    %11 = tpu.matmul %9, %10, %cst_8 {dimension_numbers = #tpu.dot_dimension_numbers<[1], [0], [0], [1], [0, 0, 1, 1], [], []>} : vector<16x128xbf16>, vector<128x64xbf16>, vector<16x64xf32> -> vector<16x64xf32>
    %c0_9 = arith.constant 0 : index
    %c0_10 = arith.constant 0 : index
    %12 = vector.load %arg5[%c0_9, %c0_10] : memref<1x64xf32, #tpu.memory_space<vmem>>, vector<1x64xf32>
    %13 = vector.broadcast %12 : vector<1x64xf32> to vector<16x64xf32>
    %14 = arith.addf %11, %13 : vector<16x64xf32>
    %cst_11 = arith.constant 0.000000e+00 : f32
    %15 = vector.broadcast %cst_11 : f32 to vector<16x64xf32>
    %16 = arith.maximumf %14, %15 : vector<16x64xf32>
    %17 = arith.truncf %16 : vector<16x64xf32> to vector<16x64xbf16>
    %c0_12 = arith.constant 0 : index
    %c0_13 = arith.constant 0 : index
    %18 = vector.load %arg6[%c0_12, %c0_13] : memref<64x32xbf16, #tpu.memory_space<vmem>>, vector<64x32xbf16>
    %cst_14 = arith.constant dense<0.000000e+00> : vector<16x32xf32>
    %19 = tpu.matmul %17, %18, %cst_14 {dimension_numbers = #tpu.dot_dimension_numbers<[1], [0], [0], [1], [0, 0, 1, 1], [], []>} : vector<16x64xbf16>, vector<64x32xbf16>, vector<16x32xf32> -> vector<16x32xf32>
    %c0_15 = arith.constant 0 : index
    %c0_16 = arith.constant 0 : index
    %20 = vector.load %arg7[%c0_15, %c0_16] : memref<1x32xf32, #tpu.memory_space<vmem>>, vector<1x32xf32>
    %21 = vector.broadcast %20 : vector<1x32xf32> to vector<16x32xf32>
    %22 = arith.addf %19, %21 : vector<16x32xf32>
    %cst_17 = arith.constant 0.000000e+00 : f32
    %23 = vector.broadcast %cst_17 : f32 to vector<16x32xf32>
    %24 = arith.maximumf %22, %23 : vector<16x32xf32>
    %c0_18 = arith.constant 0 : index
    %c0_19 = arith.constant 0 : index
    %25 = vector.load %arg8[%c0_18, %c0_19] : memref<8x32xbf16, #tpu.memory_space<vmem>>, vector<8x32xbf16>
    %26 = arith.truncf %24 : vector<16x32xf32> to vector<16x32xbf16>
    %cst_20 = arith.constant dense<0.000000e+00> : vector<8x16xf32>
    %27 = tpu.matmul %25, %26, %cst_20 {dimension_numbers = #tpu.dot_dimension_numbers<[1], [1], [0], [0], [0, 0, 1, 0], [], []>} : vector<8x32xbf16>, vector<16x32xbf16>, vector<8x16xf32> -> vector<8x16xf32>
    %28 = vector.extract_strided_slice %27 {offsets = [0, 0], sizes = [1, 16], strides = [1, 1]} : vector<8x16xf32> to vector<1x16xf32>
    %c0_21 = arith.constant 0 : index
    %c0_22 = arith.constant 0 : index
    %29 = vector.load %arg9[%c0_21, %c0_22] : memref<1x1xf32, #tpu.memory_space<vmem>>, vector<1x1xf32>
    %30 = vector.broadcast %29 : vector<1x1xf32> to vector<1x16xf32>
    %31 = arith.addf %28, %30 : vector<1x16xf32>
    %c0_23 = arith.constant 0 : index
    %c0_24 = arith.constant 0 : index
    %32 = vector.load %arg10[%c0_23, %c0_24] : memref<1x16xf32, #tpu.memory_space<vmem>>, vector<1x16xf32>
    tpu.vector_store %arg10[%c0_23, %c0_24], %31 {strides = array<i32>} : memref<1x16xf32, #tpu.memory_space<vmem>>, vector<1x16xf32>,
    return
  }
  func.func @transform_0(%arg0: i32) -> (i32, i32) {
    %c0_i32 = arith.constant 0 : i32
    %c0_i32_0 = arith.constant 0 : i32
    return %arg0, %c0_i32 : i32, i32
  }
  func.func @transform_1(%arg0: i32) -> (i32, i32) {
    %c0_i32 = arith.constant 0 : i32
    %c0_i32_0 = arith.constant 0 : i32
    %c0_i32_1 = arith.constant 0 : i32
    return %c0_i32, %c0_i32_0 : i32, i32
  }
  func.func @transform_2(%arg0: i32) -> (i32, i32) {
    %c0_i32 = arith.constant 0 : i32
    %c0_i32_0 = arith.constant 0 : i32
    %c0_i32_1 = arith.constant 0 : i32
    return %c0_i32, %c0_i32_0 : i32, i32
  }
  func.func @transform_3(%arg0: i32) -> (i32, i32) {
    %c0_i32 = arith.constant 0 : i32
    %c0_i32_0 = arith.constant 0 : i32
    %c0_i32_1 = arith.constant 0 : i32
    return %c0_i32, %c0_i32_0 : i32, i32
  }
  func.func @transform_4(%arg0: i32) -> (i32, i32) {
    %c0_i32 = arith.constant 0 : i32
    %c0_i32_0 = arith.constant 0 : i32
    %c0_i32_1 = arith.constant 0 : i32
    return %c0_i32, %c0_i32_0 : i32, i32
  }
  func.func @transform_5(%arg0: i32) -> (i32, i32) {
    %c0_i32 = arith.constant 0 : i32
    %c0_i32_0 = arith.constant 0 : i32
    %c0_i32_1 = arith.constant 0 : i32
    return %c0_i32, %c0_i32_0 : i32, i32
  }
  func.func @transform_6(%arg0: i32) -> (i32, i32) {
    %c0_i32 = arith.constant 0 : i32
    %c0_i32_0 = arith.constant 0 : i32
    %c0_i32_1 = arith.constant 0 : i32
    return %c0_i32, %c0_i32_0 : i32, i32
  }
  func.func @transform_7(%arg0: i32) -> (i32, i32) {
    %c0_i32 = arith.constant 0 : i32
    %c0_i32_0 = arith.constant 0 : i32
    %c0_i32_1 = arith.constant 0 : i32
    return %c0_i32, %c0_i32_0 : i32, i32
  }
  func.func @transform_8(%arg0: i32) -> (i32, i32) {
    %c0_i32 = arith.constant 0 : i32
    %c0_i32_0 = arith.constant 0 : i32
    %c0_i32_1 = arith.constant 0 : i32
    return %c0_i32, %c0_i32_0 : i32, i32
  }
  func.func @transform_9(%arg0: i32) -> (i32, i32) {
    %c0_i32 = arith.constant 0 : i32
    %c0_i32_0 = arith.constant 0 : i32
    return %c0_i32, %arg0 : i32, i32
  }
}

</mosaic_0001>

<bundles_post_ra>
// kernel: inhalation_classifier_forward.1
= control target key start
LH: loop header
LB: loop body
LE: loop exit
PB: predicated region body
PF: predicated region fallthrough
CT: control target
= control target key end

     0   :  { %s494_s0 = inlined_call_operand.vmem [shape: f32[16,32], index: 0, kind: input, shape index: {}]   ;;  %s495_s1 = inlined_call_operand.vmem [shape: bf16[32,128], index: 1, kind: input, shape index: {}]   ;;  %s496_s2 = inlined_call_operand.vmem [shape: f32[1,128], index: 2, kind: input, shape index: {}]   ;;  %s497_s3 = inlined_call_operand.vmem [shape: bf16[128,64], index: 3, kind: input, shape index: {}]   ;;  %s498_s4 = inlined_call_operand.vmem [shape: f32[1,64], index: 4, kind: input, shape index: {}]   ;;  %s499_s5 = inlined_call_operand.vmem [shape: bf16[64,32], index: 5, kind: input, shape index: {}]   ;;  %s500_s6 = inlined_call_operand.vmem [shape: f32[1,32], index: 6, kind: input, shape index: {}]   ;;  %s501_s7 = inlined_call_operand.vmem [shape: bf16[8,32], index: 7, kind: input, shape index: {}]   ;;  %s502_s8 = inlined_call_operand.<no memory space> [shape: f32[1,1], index: 8, kind: input, shape index: {}]   ;;  %s503_s9 = inlined_call_operand.hbm [shape: f32[1,16], index: 9, kind: output, shape index: {}]  }
   0x1   :  { %v14_v0 = vstv %s502_s8 }
   0x2   :  { %15 = vst [vmem:[#allocation2] sm:$0x1] %v14_v0 }
   0x3   :  { %v328_v1 = vld [vmem:[%s495_s1 + $0x8] sm:$0xff]  ;;  %v327_v2 = vld [vmem:[%s495_s1] sm:$0xff]  ;;  %v336_v3 = vld [vmem:[%s497_s3 + $0x38] sm:$0xff] }
   0x4   :  { %69 = vmatpush.bf16.msra.mxu0 %v328_v1  ;;  %v36_v4 = vld [vmem:[%s494_s0] sm:$0xff]  ;;  %v37_v5 = vld [vmem:[%s494_s0 + $0x8] sm:$0xff]  ;;  %148 = vmatpush.bf16.msra.mxu1 %v336_v3  ;;  %v335_v6 = vld [vmem:[%s497_s3 + $0x30] sm:$0xff] }
   0x5   :  { %16 = vsyncpa [#allocation4], 0  ;;  %v38_v7 = vpack.c.bf16 %v37_v5, %v36_v4  ;;  %vm59_vm0 = vcmask 261120   ;;  %v334_v8 = vld [vmem:[%s497_s3 + $0x28] sm:$0xff]  ;;  %v333_v9 = vld [vmem:[%s497_s3 + $0x20] sm:$0xff]  ;;  %vm201_vm1 = vcmask 523264  }
   0x6   :  { %v332_v10 = vld [vmem:[%s497_s3 + $0x18] sm:$0xff]  ;;  %v331_v11 = vld [vmem:[%s497_s3 + $0x10] sm:$0xff]  ;;  %v330_v12 = vld [vmem:[%s497_s3 + $0x8] sm:$0xff]  ;;  %v373_v35 = vmov 0   ;;  %s374_s1 = smov [#allocation3]   ;;  %s259_s24 = sshll.u32 %s503_s9, 4  ;;  %s260_s24 = int_to_ptr.hbm [resolvable:$true] %s259_s24 }
   0x7   :  { %v329_v13 = vld [vmem:[%s497_s3] sm:$0xff]  ;;  %v340_v22 = vld [vmem:[%s499_s5 + $0x18] sm:$0xff]  ;;  %v339_v23 = vld [vmem:[%s499_s5 + $0x10] sm:$0xff]  ;;  %343 = vset.pattern.permute.xlu0 %v373_v35  ;;  %s257_s22 = sshll.u32 %s374_s1, 4  ;;  %vm250_vm2 = vcmask 122880   ;;  %s258_s22 = int_to_ptr.vmem [resolvable:$true] %s257_s22 }
   0x8   :  { %70 = vmatpush.bf16.msra.mxu0 %v327_v2  ;;  %149 = vmatpush.bf16.msra.mxu1 %v335_v6  ;;  %v344_v15 = vld [vmem:[%s496_s2] ss:$0 sm:$0xff]  ;;  %v338_v24 = vld [vmem:[%s499_s5 + $0x8] sm:$0xff] }
   0x9   :  { %209 = vmatpush.bf16.msra.mxu2 %v340_v22  ;;  %v337_v25 = vld [vmem:[%s499_s5] sm:$0xff] }
   0xa   :  { %v345_v27 = vld [vmem:[%s498_s4] ss:$0 sm:$0xff] }
   0xb   :  { %276 = vmatmul.msk.bf16.vlgmr.msra.gmra.mxu0 %vm59_vm0, %v38_v7  ;;  %v242_v34 = vld [vmem:[#allocation2] sm:$0x1] }
   0xc   :  { %150 = vmatpush.bf16.msra.mxu1 %v334_v8  ;;  %245 = vperm.xlu0 %343, %v242_v34   ;;  %v346_v37 = vld [vmem:[%s500_s6] ss:$0 sm:$0xff] }
   0xd   :  { %210 = vmatpush.bf16.msra.mxu2 %v339_v23  ;;  %v221_v45 = vld [vmem:[%s501_s7] sm:$0xf] }
  0x10   :  { %151 = vmatpush.bf16.msra.mxu1 %v333_v9 }
  0x11   :  { %211 = vmatpush.bf16.msra.mxu2 %v338_v24 }
  0x14   :  { %152 = vmatpush.bf16.msra.mxu1 %v332_v10 }
  0x15   :  { %212 = vmatpush.bf16.msra.mxu2 %v337_v25 }
  0x18   :  { %153 = vmatpush.bf16.msra.mxu1 %v331_v11 }
  0x1c   :  { %154 = vmatpush.bf16.msra.mxu1 %v330_v12 }
  0x20   :  { %155 = vmatpush.bf16.msra.mxu1 %v329_v13 }
  0x7e   :  { %v246_v46 = vpop.permute.xlu0 %245 }
  0x7f   :  { %v248_v47 = vperm.slane %v246_v46, 0 }
  0x88   :  { %v72_v14 = vpop.f32.mrf.mxu0 }
  0x89   :  { %v73_v16 = vadd.f32 %v344_v15, %v72_v14 }
  0x8b   :  { %v77_v19 = vmax.f32 %v73_v16, 0.0 }
  0x90   :  { %v74_v17 = vpop.f32.mrf.mxu0 }
  0x91   :  { %v75_v18 = vadd.f32 %v344_v15, %v74_v17 }
  0x93   :  { %v78_v20 = vmax.f32 %v75_v18, 0.0 }
  0x95   :  { %v79_v21 = vpack.c.bf16 %v78_v20, %v77_v19 }
  0x97   :  { %156 = vmatmul.bf16.vlgmr.msra.gmra.mxu1 %v79_v21 }
 0x114   :  { %v157_v26 = vpop.f32.mrf.mxu1 }
 0x115   :  { %v158_v28 = vadd.f32 %v345_v27, %v157_v26 }
 0x117   :  { %v162_v31 = vmax.f32 %v158_v28, 0.0 }
 0x11c   :  { %v159_v29 = vpop.f32.mrf.mxu1 }
 0x11d   :  { %v160_v30 = vadd.f32 %v345_v27, %v159_v29 }
 0x11f   :  { %v163_v32 = vmax.f32 %v160_v30, 0.0 }
 0x121   :  { %v164_v33 = vpack.c.bf16 %v163_v32, %v162_v31 }
 0x123   :  { %325 = vmatmul.msk.bf16.vlgmr.msra.gmra.mxu2 %vm201_vm1, %v164_v33 }
 0x1a6   :  { %v214_v36 = vpop.f32.mrf.mxu2 }
 0x1a7   :  { %v215_v38 = vadd.f32 %v346_v37, %v214_v36 }
 0x1a9   :  { %v219_v41 = vmax.f32 %v215_v38, 0.0 }
 0x1ae   :  { %v216_v39 = vpop.f32.mrf.mxu2 }
 0x1af   :  { %v217_v40 = vadd.f32 %v346_v37, %v216_v39 }
 0x1b1   :  { %v220_v42 = vmax.f32 %v217_v40, 0.0 }
 0x1b3   :  { %v222_v43 = vpack.c.bf16 %v220_v42, %v219_v41 }
 0x1b5   :  { %v227_v44 = vsel %vm59_vm0, %v222_v43, 0 }
 0x1b6   :  { %236 = vmatpush.bf16.xpose.msra.mxu3 %v227_v44 }
 0x1bd   :  { %326 = vmatmul.msk.bf16.vlgmr.msra.gmra.mxu3 %vm59_vm0, %v221_v45 }
 0x240   :  { %v238_v48 = vpop.f32.mrf.mxu3 }
 0x241   :  { %v249_v49 = vadd.f32 %v248_v47, %v238_v48 }
 0x243   :  { %251 = vst.msk [vmem:[#allocation3] sm:$0x1] %vm250_vm2, %v249_v49 }
 0x244   :  { %262 = dma.vmem_to_hbm [thread:$0]  %s258_s22, 16, %s260_s24, [#allocation4]  }
 0x248   :  { %v240_v50 = vpop.f32.mrf.mxu3 }
 0x249   :  { %371 = dma.done.wait [#allocation4], 16  }
 0x24a   :  { %372 = vsyncadd [#allocation4], 4294967280 }
 0x24b   :  { %267 = vsyncpa [#allocation4], 1 }

</bundles_post_ra>
